<compile_context>
chip_gen: v7x
topology: tpu7x:2x2x1
jax: 0.10.0
libtpu: 0.0.40
codegen_flags: <defaults>
</compile_context>

<pallas_src>
import jax
import jax.numpy as jnp
from jax.experimental import pallas as pl
from jax.experimental.pallas import tpu as pltpu

LANE = 128


def _ceil_to(x, m):
    return ((x + m - 1) // m) * m


def _combined_rln_pln_kernel(x_ref, w1_ref, b1_ref, w2_ref, b2_ref, o_ref):
    # RLN: linear (bf16 MXU inputs, f32 accumulate) + bias + ReLU in f32 (VPU).
    x_bf = x_ref[...].astype(jnp.bfloat16)          # in-kernel cast: no extra HBM pass
    h = jnp.dot(x_bf, w1_ref[...], preferred_element_type=jnp.float32)
    h = jnp.maximum(h + b1_ref[...], 0.0)
    # PLN: classifier head (bf16 MXU, f32 accumulate) + bias; one cast at the store.
    out = jnp.dot(h.astype(jnp.bfloat16), w2_ref[...],
                  preferred_element_type=jnp.float32)
    o_ref[...] = (out + b2_ref[...]).astype(o_ref.dtype)


def prepare_params(w1, b1, w2, b2):
    """One-time parameter prep (hoisted out of the per-call path):
    pad classifier width to a lane multiple (lane-dense stores), pre-cast the
    weights to bf16 for the MXU, keep biases f32 with shape (1, dim)."""
    b1 = jnp.asarray(b1).reshape(1, -1).astype(jnp.float32)
    b2 = jnp.asarray(b2).reshape(1, -1).astype(jnp.float32)
    n_cls = w2.shape[1]
    n_cls_p = max(LANE, _ceil_to(n_cls, LANE))
    if n_cls_p != n_cls:
        w2 = jnp.pad(w2, ((0, 0), (0, n_cls_p - n_cls)))
        b2 = jnp.pad(b2, ((0, 0), (0, n_cls_p - n_cls)))
    return dict(w1=jnp.asarray(w1).astype(jnp.bfloat16), b1=b1,
                w2=jnp.asarray(w2).astype(jnp.bfloat16), b2=b2, n_cls=n_cls)


def _vmem_budget_bytes():
    # ~3/4 of physical VMEM: ~48 MiB on v7x (64 MiB), ~96 MiB on v5e/v6e (128 MiB).
    try:
        cap = pltpu.get_tpu_info().vmem_capacity_bytes
    except Exception:
        cap = 64 << 20  # conservative fallback (v7x per-core)
    return int(min(cap * 3 // 4, 100 << 20))


def _auto_tm(in_dim, rep_dim, n_cls_p, x_itemsize, out_itemsize, budget):
    # Resident (single-buffered) bf16 weights + f32 biases.
    fixed = 2 * (in_dim * rep_dim + rep_dim * n_cls_p) + 4 * (rep_dim + n_cls_p)
    # Per-row cost: double-buffered x and out tiles + f32 h + bf16 copy of h.
    per_row = (2 * in_dim * x_itemsize + 2 * n_cls_p * out_itemsize
               + rep_dim * (4 + 2))
    avail = budget - fixed - (4 << 20)            # scheduler / spill headroom
    tm = max(256, (avail // per_row) // 256 * 256)  # multiple of 256 for the MXU
    return int(min(tm, 2048))


def combined_rln_pln(x, params, *, tm=None, out_dtype=jnp.bfloat16):
    """CombinedRLNPLN forward: out = pln(rln(x)) = relu(x @ W1 + b1) @ W2 + b2."""
    w1, b1, w2, b2 = params["w1"], params["b1"], params["w2"], params["b2"]
    n_cls = params["n_cls"]
    n, in_dim = x.shape
    rep_dim, n_cls_p = w2.shape

    vmem_limit = _vmem_budget_bytes()
    if tm is None:
        tm = _auto_tm(in_dim, rep_dim, n_cls_p, x.dtype.itemsize,
                      jnp.dtype(out_dtype).itemsize, vmem_limit)
    tm = int(tm)

    # Give both TensorCores work on v7x when the batch is big enough.
    if tm >= n and n > 512:
        tm = _ceil_to(pl.cdiv(n, 2), 256)
    if tm >= n:
        tm = n                          # single full-row block (always layout-legal)
    else:
        tm = max(8, _ceil_to(tm, 8))    # sublane multiple for partial row tiles

    grid = (pl.cdiv(n, tm),)            # ragged last block is clipped by Pallas

    def _call(single_buffer_weights):
        wkw = ({"pipeline_mode": pl.Buffered(1)} if single_buffer_weights else {})
        return pl.pallas_call(
            _combined_rln_pln_kernel,
            out_shape=jax.ShapeDtypeStruct((n, n_cls_p), out_dtype),
            grid=grid,
            in_specs=[
                # x: streamed row tiles (double-buffered by default).
                pl.BlockSpec((tm, in_dim), lambda i: (i, 0)),
                # weights / biases: grid-invariant -> single resident buffer.
                pl.BlockSpec((in_dim, rep_dim), lambda i: (0, 0), **wkw),
                pl.BlockSpec((1, rep_dim), lambda i: (0, 0), **wkw),
                pl.BlockSpec((rep_dim, n_cls_p), lambda i: (0, 0), **wkw),
                pl.BlockSpec((1, n_cls_p), lambda i: (0, 0), **wkw),
            ],
            out_specs=pl.BlockSpec((tm, n_cls_p), lambda i: (i, 0)),
            compiler_params=pltpu.CompilerParams(
                dimension_semantics=("parallel",),
                vmem_limit_bytes=vmem_limit),
        )(x, w1, b1, w2, b2)

    try:
        out = _call(True)
    except Exception:
        # Fallback if pipeline_mode on top-level pallas_call BlockSpecs is not
        # supported by the installed JAX version.
        out = _call(False)

    return out[:, :n_cls] if n_cls_p != n_cls else out


def reference(x, w1, b1, w2, b2):
    h = jnp.maximum(x @ w1 + b1, 0.0)
    return h @ w2 + b2


if __name__ == "__main__":
    # Small, shape-consistent synthetic problem. N=200 with tm=128 exercises a
    # multi-step row grid with a ragged (clipped) last block.
    N, IN_DIM, REP_DIM, N_CLS = 200, 32, 64, 8

    key = jax.random.PRNGKey(0)
    kx, kw1, kb1, kw2, kb2 = jax.random.split(key, 5)

    x = jax.random.normal(kx, (N, IN_DIM), dtype=jnp.float32)
    w1 = jax.random.normal(kw1, (IN_DIM, REP_DIM), dtype=jnp.float32) * 0.1
    b1 = jax.random.normal(kb1, (REP_DIM,), dtype=jnp.float32) * 0.01
    w2 = jax.random.normal(kw2, (REP_DIM, N_CLS), dtype=jnp.float32) * 0.1
    b2 = jax.random.normal(kb2, (N_CLS,), dtype=jnp.float32) * 0.01

    params = prepare_params(w1, b1, w2, b2)       # one-time prep (pad + bf16 cast)
    out = combined_rln_pln(x, params, tm=128)
    out = jax.block_until_ready(out)

    ref = reference(x, w1, b1, w2, b2)
    assert out.shape == (N, N_CLS)
    # bf16 MXU inputs + bf16 output with f32 accumulation -> relaxed tolerance.
    err = float(jnp.max(jnp.abs(out.astype(jnp.float32) - ref)))
    assert err < 5e-2, err

    print("KERNEL_OK")
</pallas_src>

<mosaic_0001>
module attributes {stable_mosaic.version = 11 : i64} {
  func.func @_combined_rln_pln_kernel(%arg0: i32, %arg1: memref<128x32xf32, #tpu.memory_space<vmem>>, %arg2: memref<32x64xbf16, #tpu.memory_space<vmem>>, %arg3: memref<1x64xf32, #tpu.memory_space<vmem>>, %arg4: memref<64x128xbf16, #tpu.memory_space<vmem>>, %arg5: memref<1x128xf32, #tpu.memory_space<vmem>>, %arg6: memref<128x128xbf16, #tpu.memory_space<vmem>>) attributes {dimension_semantics = [#tpu.dimension_semantics<parallel>], iteration_bounds = array<i64: 2>, scalar_prefetch = 0 : i64, scratch_operands = 0 : i64, tpu.core_type = #tpu.core_type<tc>, window_params = [{transform_indices = @transform_0, window_bounds = array<i64: 128, 32>}, {pipeline_mode = #tpu.pipeline_mode<synchronous>, transform_indices = @transform_1, window_bounds = array<i64: 32, 64>}, {pipeline_mode = #tpu.pipeline_mode<synchronous>, transform_indices = @transform_2, window_bounds = array<i64: 1, 64>}, {pipeline_mode = #tpu.pipeline_mode<synchronous>, transform_indices = @transform_3, window_bounds = array<i64: 64, 128>}, {pipeline_mode = #tpu.pipeline_mode<synchronous>, transform_indices = @transform_4, window_bounds = array<i64: 1, 128>}, {transform_indices = @transform_5, window_bounds = array<i64: 128, 128>}]} {
    %c0 = arith.constant 0 : index
    %c0_0 = arith.constant 0 : index
    %0 = vector.load %arg1[%c0, %c0_0] : memref<128x32xf32, #tpu.memory_space<vmem>>, vector<128x32xf32>
    %1 = arith.truncf %0 : vector<128x32xf32> to vector<128x32xbf16>
    %c0_1 = arith.constant 0 : index
    %c0_2 = arith.constant 0 : index
    %2 = vector.load %arg2[%c0_1, %c0_2] : memref<32x64xbf16, #tpu.memory_space<vmem>>, vector<32x64xbf16>
    %cst = arith.constant dense<0.000000e+00> : vector<128x64xf32>
    %3 = tpu.matmul %1, %2, %cst {dimension_numbers = #tpu.dot_dimension_numbers<[1], [0], [0], [1], [0, 0, 1, 1], [], []>} : vector<128x32xbf16>, vector<32x64xbf16>, vector<128x64xf32> -> vector<128x64xf32>
    %c0_3 = arith.constant 0 : index
    %c0_4 = arith.constant 0 : index
    %4 = vector.load %arg3[%c0_3, %c0_4] : memref<1x64xf32, #tpu.memory_space<vmem>>, vector<1x64xf32>
    %5 = vector.broadcast %4 : vector<1x64xf32> to vector<128x64xf32>
    %6 = arith.addf %3, %5 : vector<128x64xf32>
    %cst_5 = arith.constant 0.000000e+00 : f32
    %7 = vector.broadcast %cst_5 : f32 to vector<128x64xf32>
    %8 = arith.maximumf %6, %7 : vector<128x64xf32>
    %9 = arith.truncf %8 : vector<128x64xf32> to vector<128x64xbf16>
    %c0_6 = arith.constant 0 : index
    %c0_7 = arith.constant 0 : index
    %10 = vector.load %arg4[%c0_6, %c0_7] : memref<64x128xbf16, #tpu.memory_space<vmem>>, vector<64x128xbf16>
    %cst_8 = arith.constant dense<0.000000e+00> : vector<128x128xf32>
    %11 = tpu.matmul %9, %10, %cst_8 {dimension_numbers = #tpu.dot_dimension_numbers<[1], [0], [0], [1], [0, 0, 1, 1], [], []>} : vector<128x64xbf16>, vector<64x128xbf16>, vector<128x128xf32> -> vector<128x128xf32>
    %c0_9 = arith.constant 0 : index
    %c0_10 = arith.constant 0 : index
    %12 = vector.load %arg5[%c0_9, %c0_10] : memref<1x128xf32, #tpu.memory_space<vmem>>, vector<1x128xf32>
    %13 = vector.broadcast %12 : vector<1x128xf32> to vector<128x128xf32>
    %14 = arith.addf %11, %13 : vector<128x128xf32>
    %15 = arith.truncf %14 : vector<128x128xf32> to vector<128x128xbf16>
    %c0_11 = arith.constant 0 : index
    %c0_12 = arith.constant 0 : index
    %16 = vector.load %arg6[%c0_11, %c0_12] : memref<128x128xbf16, #tpu.memory_space<vmem>>, vector<128x128xbf16>
    tpu.vector_store %arg6[%c0_11, %c0_12], %15 {strides = array<i32>} : memref<128x128xbf16, #tpu.memory_space<vmem>>, vector<128x128xbf16>,
    return
  }
  func.func @transform_0(%arg0: i32) -> (i32, i32) {
    %c0_i32 = arith.constant 0 : i32
    %c0_i32_0 = arith.constant 0 : i32
    return %arg0, %c0_i32 : i32, i32
  }
  func.func @transform_1(%arg0: i32) -> (i32, i32) {
    %c0_i32 = arith.constant 0 : i32
    %c0_i32_0 = arith.constant 0 : i32
    %c0_i32_1 = arith.constant 0 : i32
    return %c0_i32, %c0_i32_0 : i32, i32
  }
  func.func @transform_2(%arg0: i32) -> (i32, i32) {
    %c0_i32 = arith.constant 0 : i32
    %c0_i32_0 = arith.constant 0 : i32
    %c0_i32_1 = arith.constant 0 : i32
    return %c0_i32, %c0_i32_0 : i32, i32
  }
  func.func @transform_3(%arg0: i32) -> (i32, i32) {
    %c0_i32 = arith.constant 0 : i32
    %c0_i32_0 = arith.constant 0 : i32
    %c0_i32_1 = arith.constant 0 : i32
    return %c0_i32, %c0_i32_0 : i32, i32
  }
  func.func @transform_4(%arg0: i32) -> (i32, i32) {
    %c0_i32 = arith.constant 0 : i32
    %c0_i32_0 = arith.constant 0 : i32
    %c0_i32_1 = arith.constant 0 : i32
    return %c0_i32, %c0_i32_0 : i32, i32
  }
  func.func @transform_5(%arg0: i32) -> (i32, i32) {
    %c0_i32 = arith.constant 0 : i32
    %c0_i32_0 = arith.constant 0 : i32
    return %arg0, %c0_i32 : i32, i32
  }
}

module attributes {stable_mosaic.version = 11 : i64} {
  func.func @_combined_rln_pln_kernel(%arg0: i32, %arg1: memref<128x32xf32, #tpu.memory_space<vmem>>, %arg2: memref<32x64xbf16, #tpu.memory_space<vmem>>, %arg3: memref<1x64xf32, #tpu.memory_space<vmem>>, %arg4: memref<64x128xbf16, #tpu.memory_space<vmem>>, %arg5: memref<1x128xf32, #tpu.memory_space<vmem>>, %arg6: memref<128x128xbf16, #tpu.memory_space<vmem>>) attributes {dimension_semantics = [#tpu.dimension_semantics<parallel>], iteration_bounds = array<i64: 2>, scalar_prefetch = 0 : i64, scratch_operands = 0 : i64, tpu.core_type = #tpu.core_type<tc>, window_params = [{transform_indices = @transform_0, window_bounds = array<i64: 128, 32>}, {pipeline_mode = #tpu.pipeline_mode<synchronous>, transform_indices = @transform_1, window_bounds = array<i64: 32, 64>}, {pipeline_mode = #tpu.pipeline_mode<synchronous>, transform_indices = @transform_2, window_bounds = array<i64: 1, 64>}, {pipeline_mode = #tpu.pipeline_mode<synchronous>, transform_indices = @transform_3, window_bounds = array<i64: 64, 128>}, {pipeline_mode = #tpu.pipeline_mode<synchronous>, transform_indices = @transform_4, window_bounds = array<i64: 1, 128>}, {transform_indices = @transform_5, window_bounds = array<i64: 128, 128>}]} {
    %c0 = arith.constant 0 : index
    %c0_0 = arith.constant 0 : index
    %0 = vector.load %arg1[%c0, %c0_0] : memref<128x32xf32, #tpu.memory_space<vmem>>, vector<128x32xf32>
    %1 = arith.truncf %0 : vector<128x32xf32> to vector<128x32xbf16>
    %c0_1 = arith.constant 0 : index
    %c0_2 = arith.constant 0 : index
    %2 = vector.load %arg2[%c0_1, %c0_2] : memref<32x64xbf16, #tpu.memory_space<vmem>>, vector<32x64xbf16>
    %cst = arith.constant dense<0.000000e+00> : vector<128x64xf32>
    %3 = tpu.matmul %1, %2, %cst {dimension_numbers = #tpu.dot_dimension_numbers<[1], [0], [0], [1], [0, 0, 1, 1], [], []>} : vector<128x32xbf16>, vector<32x64xbf16>, vector<128x64xf32> -> vector<128x64xf32>
    %c0_3 = arith.constant 0 : index
    %c0_4 = arith.constant 0 : index
    %4 = vector.load %arg3[%c0_3, %c0_4] : memref<1x64xf32, #tpu.memory_space<vmem>>, vector<1x64xf32>
    %5 = vector.broadcast %4 : vector<1x64xf32> to vector<128x64xf32>
    %6 = arith.addf %3, %5 : vector<128x64xf32>
    %cst_5 = arith.constant 0.000000e+00 : f32
    %7 = vector.broadcast %cst_5 : f32 to vector<128x64xf32>
    %8 = arith.maximumf %6, %7 : vector<128x64xf32>
    %9 = arith.truncf %8 : vector<128x64xf32> to vector<128x64xbf16>
    %c0_6 = arith.constant 0 : index
    %c0_7 = arith.constant 0 : index
    %10 = vector.load %arg4[%c0_6, %c0_7] : memref<64x128xbf16, #tpu.memory_space<vmem>>, vector<64x128xbf16>
    %cst_8 = arith.constant dense<0.000000e+00> : vector<128x128xf32>
    %11 = tpu.matmul %9, %10, %cst_8 {dimension_numbers = #tpu.dot_dimension_numbers<[1], [0], [0], [1], [0, 0, 1, 1], [], []>} : vector<128x64xbf16>, vector<64x128xbf16>, vector<128x128xf32> -> vector<128x128xf32>
    %c0_9 = arith.constant 0 : index
    %c0_10 = arith.constant 0 : index
    %12 = vector.load %arg5[%c0_9, %c0_10] : memref<1x128xf32, #tpu.memory_space<vmem>>, vector<1x128xf32>
    %13 = vector.broadcast %12 : vector<1x128xf32> to vector<128x128xf32>
    %14 = arith.addf %11, %13 : vector<128x128xf32>
    %15 = arith.truncf %14 : vector<128x128xf32> to vector<128x128xbf16>
    %c0_11 = arith.constant 0 : index
    %c0_12 = arith.constant 0 : index
    %16 = vector.load %arg6[%c0_11, %c0_12] : memref<128x128xbf16, #tpu.memory_space<vmem>>, vector<128x128xbf16>
    tpu.vector_store %arg6[%c0_11, %c0_12], %15 {strides = array<i32>} : memref<128x128xbf16, #tpu.memory_space<vmem>>, vector<128x128xbf16>,
    return
  }
  func.func @transform_0(%arg0: i32) -> (i32, i32) {
    %c0_i32 = arith.constant 0 : i32
    %c0_i32_0 = arith.constant 0 : i32
    return %arg0, %c0_i32 : i32, i32
  }
  func.func @transform_1(%arg0: i32) -> (i32, i32) {
    %c0_i32 = arith.constant 0 : i32
    %c0_i32_0 = arith.constant 0 : i32
    %c0_i32_1 = arith.constant 0 : i32
    return %c0_i32, %c0_i32_0 : i32, i32
  }
  func.func @transform_2(%arg0: i32) -> (i32, i32) {
    %c0_i32 = arith.constant 0 : i32
    %c0_i32_0 = arith.constant 0 : i32
    %c0_i32_1 = arith.constant 0 : i32
    return %c0_i32, %c0_i32_0 : i32, i32
  }
  func.func @transform_3(%arg0: i32) -> (i32, i32) {
    %c0_i32 = arith.constant 0 : i32
    %c0_i32_0 = arith.constant 0 : i32
    %c0_i32_1 = arith.constant 0 : i32
    return %c0_i32, %c0_i32_0 : i32, i32
  }
  func.func @transform_4(%arg0: i32) -> (i32, i32) {
    %c0_i32 = arith.constant 0 : i32
    %c0_i32_0 = arith.constant 0 : i32
    %c0_i32_1 = arith.constant 0 : i32
    return %c0_i32, %c0_i32_0 : i32, i32
  }
  func.func @transform_5(%arg0: i32) -> (i32, i32) {
    %c0_i32 = arith.constant 0 : i32
    %c0_i32_0 = arith.constant 0 : i32
    return %arg0, %c0_i32 : i32, i32
  }
}

</mosaic_0001>

<bundles_post_ra>
// kernel: tpu_custom_call.1
= control target key start
LH: loop header
LB: loop body
LE: loop exit
PB: predicated region body
PF: predicated region fallthrough
CT: control target
= control target key end

     0   :  { %10 = vsyncpa [#allocation3], 0  ;;  %s1286_s0 = inlined_call_operand.vmem [shape: f32[200,32], index: 0, kind: input, shape index: {}]   ;;  %s1287_s1 = inlined_call_operand.vmem [shape: bf16[32,64], index: 1, kind: input, shape index: {}]   ;;  %s1288_s2 = inlined_call_operand.vmem [shape: f32[1,64], index: 2, kind: input, shape index: {}]   ;;  %s1289_s3 = inlined_call_operand.vmem [shape: bf16[64,128], index: 3, kind: input, shape index: {}]   ;;  %s1290_s4 = inlined_call_operand.vmem [shape: f32[1,128], index: 4, kind: input, shape index: {}]   ;;  %s1291_s5 = inlined_call_operand.hbm [shape: bf16[200,128], index: 5, kind: output, shape index: {}]  }
   0x1   :  { %12 = vsyncpa [#allocation3 + $0x1], 0  ;;  %s1096_s18 = smov 0   ;;  %s1098_s19 = smov 0  }
   0x2   :  { %s1100_s20 = smov 0   ;;  %s1102_s21 = smov 0  }
   0x3 LB: > { %s1117_s22 = sadd.s32 4294967295, %s1061_s21   ;;  %s767_s23 = sadd.s32 4294967294, %s1061_s21   ;;  %s1061_s21 = sphi %s1102_s21, %s1297_s21   ;;  %s1057_s20 = sphi %s1100_s20, %s1296_s20   ;;  %s1053_s19 = sphi %s1098_s19, %s1295_s19   ;;  %s1049_s18 = sphi %s1096_s18, %s1294_s18  }
   0x4   : > { %s1121_s24 = sadd.s32 1, %s1061_s21   ;;  %s135_s25 = sadd.s32 1, %s1057_s20 }
   0x5   : > { %s132_s26 = ssub.s32 %s1061_s21, %s1121_s24  ;;  %p145_p0 = scmp.ne.s32.totalorder %s1057_s20, %s1053_s19 }
   0x6   : > { %p133_p1 = scmp.eq.s32.totalorder %s132_s26, 0  ;;  %p146_p2 = scmp.eq.s32.totalorder %s1117_s22, 1 }
   0x7   : > { %p151_p3 = scmp.ne.s32.totalorder %s1053_s19, %s1049_s18  ;;  %p152_p4 = scmp.eq.s32.totalorder %s767_s23, 1 }
   0x8   : > { %s1132_s27 = scalar_select %p133_p1, %s1057_s20, %s135_s25  }
   0x9   : > { %p1134_p5 = por %p146_p2, %p145_p0  ;;  %p1138_p6 = por %p152_p4, %p151_p3 }
   0xa   : > { %p770_p7 = scmp.ge.s32.totalorder %s1061_s21, 1  ;;  %p199_p8 = scmp.lt.s32.totalorder %s1061_s21, 3 }
   0xc   : > { %p200_p9 = pnand %p770_p7, %p199_p8 }
   0xd   : > { %v993_v0 = vld [vmem:[%s1287_s1] sm:$0xff] (!%p200_p9)   ;;  %s1148_s7 = sshll.u32 (!%p200_p9), %s1117_s22, 4  ;;  %v994_v1 = vld [vmem:[%s1287_s1 + $0x8] sm:$0xff] (!%p200_p9)   ;;  %vm298_vm0 = vcmask (!%p200_p9), 261120   ;;  %v997_v28 = vld [vmem:[%s1289_s3 + $0x10] sm:$0xff] (!%p200_p9)   ;;  %vm483_vm1 = vcmask (!%p200_p9), 523264  }
   0xe   : > { %203 = sbr.rel (%p200_p9) target bundleno = 523 (0x20b), region = 40  ;;  %p236_p10 = scmp.lt.s32.totalorder (!%p200_p9), %s1148_s7, 24  ;;  %909 = vmatprep.subr.bf16.mxu0 (!%p200_p9), %v993_v0  ;;  %v995_v2 = vld [vmem:[%s1289_s3] sm:$0xff] (!%p200_p9)   ;;  %v996_v3 = vld [vmem:[%s1289_s3 + $0x8] sm:$0xff] (!%p200_p9)   ;;  %v998_v29 = vld [vmem:[%s1289_s3 + $0x18] sm:$0xff] (!%p200_p9)  }
   0xf   : > { %910 = vmatpush3.bf16.msra.mxu0 (!%p200_p9), %v993_v0  ;;  %929 = vmatprep.subr.bf16.mxu1 (!%p200_p9), %v995_v2  ;;  %v774_v30 = vld [vmem:[%s1288_s2] ss:$0 sm:$0xff] (!%p200_p9)  ;;  %s228_s10 = sand.u32 (!%p200_p9), 1, %s1053_s19  }
  0x10   : > { %911 = vmatprep.subr.bf16.mxu0 (!%p200_p9), %v994_v1  ;;  %930 = vmatpush3.bf16.msra.mxu1 (!%p200_p9), %v995_v2  ;;  %s771_s13 = sshll.u32 (!%p200_p9), %s228_s10, 6 }
  0x11   : > { %931 = vmatprep.subr.bf16.mxu1 (!%p200_p9), %v996_v3  ;;  %s1213_s14 = scalar_lea.vmem (!%p200_p9), [#allocation2], %s771_s13 }
  0x13   : > { %912 = vmatpush3.bf16.msra.mxu0 (!%p200_p9), %v994_v1 }
  0x14   : > { %932 = vmatpush3.bf16.msra.mxu1 (!%p200_p9), %v996_v3 }
  0x15   : > { %s237_s12 = scalar_select %p236_p10, %s1148_s7, 24  ;;  %933 = vmatprep.subr.bf16.mxu1 %v997_v28 }
  0x16   : > { %s694_s16 = ssub.s32 (%p1134_p5), 25, %s1148_s7 }
  0x17   : > { %s773_s15 = sshll.u32 %s237_s12, 3  ;;  %p695_p11 = scmp.lt.s32.totalorder (%p1134_p5), %s694_s16, 16 }
  0x18   : > { %s1164_s23 = scalar_lea.vmem %s1286_s0, %s773_s15  ;;  %934 = vmatpush3.bf16.msra.mxu1 %v997_v28  ;;  %s1225_s15 = scalar_lea.sflag [#allocation3], %s228_s10 }
  0x19   : > { %v251_v4 = vld [vmem:[%s1164_s23] sm:$0xff]  ;;  %v252_v5 = vld [vmem:[%s1164_s23 + $0x8] sm:$0xff]  ;;  %v253_v6 = vld [vmem:[%s1164_s23 + $0x10] sm:$0xff]  ;;  %935 = vmatprep.subr.bf16.mxu1 %v998_v29 }
  0x1a   : > { %v267_v7 = vpack.c.bf16 %v252_v5, %v251_v4  ;;  %v254_v8 = vld [vmem:[%s1164_s23 + $0x18] sm:$0xff]  ;;  %v255_v9 = vld [vmem:[%s1164_s23 + $0x20] sm:$0xff]  ;;  %v256_v10 = vld [vmem:[%s1164_s23 + $0x28] sm:$0xff] }
  0x1b   : > { %v268_v11 = vpack.c.bf16 %v254_v8, %v253_v6  ;;  %v269_v12 = vpack.c.bf16 %v256_v10, %v255_v9  ;;  %v257_v13 = vld [vmem:[%s1164_s23 + $0x30] sm:$0xff]  ;;  %v258_v14 = vld [vmem:[%s1164_s23 + $0x38] sm:$0xff]  ;;  %v259_v15 = vld [vmem:[%s1164_s23 + $0x40] sm:$0xff] }
  0x1c   : > { %913 = vmatprep.mubr.msk.bf16.mxu0 %vm298_vm0, %v267_v7  ;;  %v260_v16 = vld [vmem:[%s1164_s23 + $0x48] sm:$0xff]  ;;  %v270_v17 = vpack.c.bf16 %v258_v14, %v257_v13  ;;  %v261_v19 = vld [vmem:[%s1164_s23 + $0x50] sm:$0xff]  ;;  %v262_v20 = vld [vmem:[%s1164_s23 + $0x58] sm:$0xff]  ;;  %936 = vmatpush3.bf16.msra.mxu1 %v998_v29 }
  0x1d   : > { %914 = vmatmul.mubr.msk.bf16.vlgmr.msra.gmra.mrb[0].mxu0 %vm298_vm0, %v268_v11  ;;  %v271_v18 = vpack.c.bf16 %v260_v16, %v259_v15  ;;  %v263_v21 = vld [vmem:[%s1164_s23 + $0x60] sm:$0xff]  ;;  %v264_v22 = vld [vmem:[%s1164_s23 + $0x68] sm:$0xff]  ;;  %v272_v23 = vpack.c.bf16 %v262_v20, %v261_v19  ;;  %v265_v25 = vld [vmem:[%s1164_s23 + $0x70] sm:$0xff] }
  0x1e   : > { %917 = vmatprep.mubr.msk.bf16.mxu0 %vm298_vm0, %v269_v12  ;;  %v273_v24 = vpack.c.bf16 %v264_v22, %v263_v21  ;;  %v266_v26 = vld [vmem:[%s1164_s23 + $0x78] sm:$0xff] }
  0x1f   : > { %v274_v27 = vpack.c.bf16 %v266_v26, %v265_v25 }
  0x25   : > { %918 = vmatmul.mubr.msk.bf16.gmra.mrb[4].mxu0 %vm298_vm0, %v270_v17 }
  0x26   : > { %921 = vmatprep.mubr.msk.bf16.mxu0 %vm298_vm0, %v271_v18 }
  0x2d   : > { %922 = vmatmul.mubr.msk.bf16.gmra.mrb[8].mxu0 %vm298_vm0, %v272_v23 }
  0x2e   : > { %925 = vmatprep.mubr.msk.bf16.mxu0 %vm298_vm0, %v273_v24  ;;  %v785_v24 = vld [vmem:[%s1290_s4] ss:$0 sm:$0xff] }
  0x35   : > { %926 = vmatmul.mubr.msk.bf16.gmra.mrb[12].mxu0 %vm298_vm0, %v274_v27 }
  0xf0   : > { %v915_v31 = vpop.f32.mrb[0].mxu0 }
  0xf1   : > { %v366_v32 = vadd.f32 %v915_v31, %v774_v30  ;;  %v357_v33 = vpop.f32.mrb[1].mxu0 }
  0xf2   : > { %v358_v34 = vadd.f32 %v774_v30, %v357_v33  ;;  %v916_v35 = vpop.f32.mrb[2].mxu0 }
  0xf3   : > { %v369_v36 = vadd.f32 %v916_v35, %v774_v30  ;;  %v360_v37 = vpop.f32.mrb[3].mxu0  ;;  %v422_v39 = vmax.f32 %v366_v32, 0.0 }
  0xf4   : > { %v361_v38 = vadd.f32 %v774_v30, %v360_v37  ;;  %v420_v41 = vmax.f32 %v358_v34, 0.0 }
  0xf5   : > { %v423_v40 = vmax.f32 %v369_v36, 0.0 }
  0xf6   : > { %v421_v42 = vmax.f32 %v361_v38, 0.0 }
  0xf7   : > { %v437_v43 = vpack.c.bf16 %v423_v40, %v422_v39 }
  0xf8   : > { %v919_v44 = vpop.f32.mrb[4].mxu0  ;;  %v436_v45 = vpack.c.bf16 %v421_v42, %v420_v41 }
  0xf9   : > { %v382_v46 = vadd.f32 %v919_v44, %v774_v30  ;;  %v373_v47 = vpop.f32.mrb[5].mxu0 }
  0xfa   : > { %v374_v48 = vadd.f32 %v774_v30, %v373_v47  ;;  %v920_v49 = vpop.f32.mrb[6].mxu0  ;;  %937 = vmatprep.mubr.msk.bf16.mxu1 %vm483_vm1, %v436_v45 }
  0xfb   : > { %v385_v50 = vadd.f32 %v920_v49, %v774_v30  ;;  %v376_v51 = vpop.f32.mrb[7].mxu0  ;;  %938 = vmatmul.mubr.msk.bf16.vlgmr.msra.gmra.mrb[0].mxu1 %vm483_vm1, %v437_v43  ;;  %v426_v53 = vmax.f32 %v382_v46, 0.0 }
  0xfc   : > { %v377_v52 = vadd.f32 %v774_v30, %v376_v51  ;;  %v424_v55 = vmax.f32 %v374_v48, 0.0 }
  0xfd   : > { %v427_v54 = vmax.f32 %v385_v50, 0.0 }
  0xfe   : > { %v425_v56 = vmax.f32 %v377_v52, 0.0 }
  0xff   : > { %v439_v57 = vpack.c.bf16 %v427_v54, %v426_v53 }
 0x100   : > { %v438_v58 = vpack.c.bf16 %v425_v56, %v424_v55  ;;  %v923_v59 = vpop.f32.mrb[8].mxu0 }
 0x101   : > { %v398_v60 = vadd.f32 %v923_v59, %v774_v30  ;;  %v389_v61 = vpop.f32.mrb[9].mxu0 }
 0x102   : > { %v390_v62 = vadd.f32 %v774_v30, %v389_v61  ;;  %v924_v63 = vpop.f32.mrb[10].mxu0  ;;  %941 = vmatprep.mubr.msk.bf16.mxu1 %vm483_vm1, %v438_v58 }
 0x103   : > { %v401_v0 = vadd.f32 %v924_v63, %v774_v30  ;;  %v392_v1 = vpop.f32.mrb[11].mxu0  ;;  %942 = vmatmul.mubr.msk.bf16.gmra.mrb[4].mxu1 %vm483_vm1, %v439_v57  ;;  %v430_v3 = vmax.f32 %v398_v60, 0.0 }
 0x104   : > { %v393_v2 = vadd.f32 %v774_v30, %v392_v1  ;;  %v428_v5 = vmax.f32 %v390_v62, 0.0 }
 0x105   : > { %v431_v4 = vmax.f32 %v401_v0, 0.0 }
 0x106   : > { %v429_v6 = vmax.f32 %v393_v2, 0.0 }
 0x107   : > { %v441_v7 = vpack.c.bf16 %v431_v4, %v430_v3 }
 0x108   : > { %v440_v8 = vpack.c.bf16 %v429_v6, %v428_v5  ;;  %v927_v9 = vpop.f32.mrb[12].mxu0 }
 0x109   : > { %v414_v10 = vadd.f32 %v927_v9, %v774_v30  ;;  %v405_v11 = vpop.f32.mrb[13].mxu0 }
 0x10a   : > { %v406_v12 = vadd.f32 %v774_v30, %v405_v11  ;;  %v928_v13 = vpop.f32.mrb[14].mxu0  ;;  %945 = vmatprep.mubr.msk.bf16.mxu1 %vm483_vm1, %v440_v8 }
 0x10b   : > { %v417_v14 = vadd.f32 %v928_v13, %v774_v30  ;;  %v408_v15 = vpop.f32.mrb[15].mxu0  ;;  %946 = vmatmul.mubr.msk.bf16.gmra.mrb[8].mxu1 %vm483_vm1, %v441_v7  ;;  %v434_v17 = vmax.f32 %v414_v10, 0.0 }
 0x10c   : > { %v409_v16 = vadd.f32 %v774_v30, %v408_v15  ;;  %v432_v19 = vmax.f32 %v406_v12, 0.0 }
 0x10d   : > { %v435_v18 = vmax.f32 %v417_v14, 0.0 }
 0x10e   : > { %v433_v20 = vmax.f32 %v409_v16, 0.0 }
 0x10f   : > { %v443_v21 = vpack.c.bf16 %v435_v18, %v434_v17 }
 0x110   : > { %v442_v22 = vpack.c.bf16 %v433_v20, %v432_v19 }
 0x112   : > { %949 = vmatprep.mubr.msk.bf16.mxu1 %vm483_vm1, %v442_v22 }
 0x113   : > { %950 = vmatmul.mubr.msk.bf16.gmra.mrb[12].mxu1 %vm483_vm1, %v443_v21 }
 0x1ce   : > { %v939_v23 = vpop.f32.mrb[0].mxu1 }
 0x1cf   : > { %v542_v25 = vpop.f32.mrb[1].mxu1  ;;  %v551_v27 = vadd.f32 %v939_v23, %v785_v24 }
 0x1d0   : > { %v940_v26 = vpop.f32.mrb[2].mxu1  ;;  %v543_v30 = vadd.f32 %v785_v24, %v542_v25 }
 0x1d1   : > { %v554_v28 = vadd.f32 %v940_v26, %v785_v24  ;;  %v545_v29 = vpop.f32.mrb[3].mxu1 }
 0x1d2   : > { %v546_v31 = vadd.f32 %v785_v24, %v545_v29 }
 0x1d3   : > { %v848_v32 = vpack.c.bf16 %v554_v28, %v551_v27 }
 0x1d4   : > { %v843_v33 = vpack.c.bf16 %v546_v31, %v543_v30 }
 0x1d5   : > { %880 = vst [vmem:[%s1213_s14 + $0x8] sm:$0xff] %v848_v32  }
 0x1d6   : > { %844 = vst [vmem:[%s1213_s14] sm:$0xff] %v843_v33   ;;  %v943_v34 = vpop.f32.mrb[4].mxu1 }
 0x1d7   : > { %v558_v35 = vpop.f32.mrb[5].mxu1  ;;  %v567_v37 = vadd.f32 %v943_v34, %v785_v24 }
 0x1d8   : > { %v944_v36 = vpop.f32.mrb[6].mxu1  ;;  %v559_v40 = vadd.f32 %v785_v24, %v558_v35 }
 0x1d9   : > { %v570_v38 = vadd.f32 %v944_v36, %v785_v24  ;;  %v561_v39 = vpop.f32.mrb[7].mxu1 }
 0x1da   : > { %v562_v41 = vadd.f32 %v785_v24, %v561_v39 }
 0x1db   : > { %v858_v42 = vpack.c.bf16 %v570_v38, %v567_v37 }
 0x1dc   : > { %v853_v43 = vpack.c.bf16 %v562_v41, %v559_v40 }
 0x1dd   : > { %882 = vst [vmem:[%s1213_s14 + $0x18] sm:$0xff] %v858_v42  }
 0x1de   : > { %881 = vst [vmem:[%s1213_s14 + $0x10] sm:$0xff] %v853_v43   ;;  %v947_v44 = vpop.f32.mrb[8].mxu1 }
 0x1df   : > { %v574_v45 = vpop.f32.mrb[9].mxu1  ;;  %v583_v47 = vadd.f32 %v947_v44, %v785_v24 }
 0x1e0   : > { %v948_v46 = vpop.f32.mrb[10].mxu1  ;;  %v575_v50 = vadd.f32 %v785_v24, %v574_v45 }
 0x1e1   : > { %v586_v48 = vadd.f32 %v948_v46, %v785_v24  ;;  %v577_v49 = vpop.f32.mrb[11].mxu1 }
 0x1e2   : > { %v578_v51 = vadd.f32 %v785_v24, %v577_v49 }
 0x1e3   : > { %v868_v52 = vpack.c.bf16 %v586_v48, %v583_v47 }
 0x1e4   : > { %v863_v53 = vpack.c.bf16 %v578_v51, %v575_v50 }
 0x1e5   : > { %884 = vst [vmem:[%s1213_s14 + $0x28] sm:$0xff] %v868_v52  }
 0x1e6   : > { %883 = vst [vmem:[%s1213_s14 + $0x20] sm:$0xff] %v863_v53   ;;  %v951_v54 = vpop.f32.mrb[12].mxu1 }
 0x1e7   : > { %v590_v55 = vpop.f32.mrb[13].mxu1  ;;  %v599_v57 = vadd.f32 %v951_v54, %v785_v24 }
 0x1e8   : > { %v952_v56 = vpop.f32.mrb[14].mxu1  ;;  %v591_v60 = vadd.f32 %v785_v24, %v590_v55  ;;  %692 = sbr.rel (!%p1134_p5) target bundleno = 523 (0x20b), region = 44 }
 0x1e9   : > { %v602_v58 = vadd.f32 %v952_v56, %v785_v24  ;;  %v593_v59 = vpop.f32.mrb[15].mxu1 }
 0x1ea   : > { %v594_v61 = vadd.f32 %v785_v24, %v593_v59 }
 0x1eb   : > { %v878_v62 = vpack.c.bf16 %v602_v58, %v599_v57 }
 0x1ec   : > { %v873_v63 = vpack.c.bf16 %v594_v61, %v591_v60 }
 0x1ed   : > { %886 = vst [vmem:[%s1213_s14 + $0x38] sm:$0xff] %v878_v62  }
 0x1ee   : > { %885 = vst [vmem:[%s1213_s14 + $0x30] sm:$0xff] %v873_v63  }
 0x1ef   : > { %s1299_s16 = smov (!%p695_p11, %s694_s16), 16 }
 0x1f0   : > { %s1230_s17 = sshll.u32 %s1299_s16, 6 }
 0x1f1   : > { %s699_s23 = ssub.s32 1024, %s1230_s17 }
 0x1f2   : > { %700 = vsyncadd %s1225_s15, %s699_s23  ;;  %p817_p12 = scmp.ne.s32.totalorder %s1230_s17, 0  ;;  %s839_s25 = sshll.u32 %s1117_s22, 10 }
 0x1f3   : > { %s1239_s30 = scalar_lea.hbm %s1291_s5, %s839_s25  ;;  %s705_s7 = sshll.u32 %s1213_s14, 4  ;;  %s1242_s7 = int_to_ptr.vmem [resolvable:$true] %s705_s7 }
 0x1f4   : > { %s999_s6 = scalar_lea.vmem %s1242_s7, %s1230_s17  ;;  %s1063_s8 = smov [#allocation2]  }
 0x1f5   : > { %p1000_p13 = scmp.ne.s32.totalorder %s1242_s7, %s999_s6  ;;  %s1003_s9 = sshll.u32 %s1063_s8, 4  ;;  %s1004_s9 = int_to_ptr.vmem [resolvable:$false] %s1003_s9 }
 0x1f6   : > { %s1005_s22 = scalar_lea.vmem %s1004_s9, 2048  ;;  %p1006_p2 = scmp.lt.s32.totalorder %s1242_s7, %s1004_s9 }
 0x1f7   : > { %p1001_p0 = pnand %p1000_p13, %p817_p12  ;;  %p1007_p3 = scmp.lt.s32.totalorder %s1005_s22, %s999_s6 }
 0x1f9   : > { %p1002_p1 = pneg %p1001_p0  ;;  %p1008_p4 = por %p1007_p3, %p1006_p2 }
 0x1fb   : > { %p1009_p5 = pnand %p1008_p4, %p1002_p1 }
 0x1fd   : > { %1012 = shalt.err (!%p1009_p5)
}
 0x1fe   : > { %s1013_s10 = scalar_lea.hbm %s1239_s30, %s1230_s17  ;;  %s1017_s13 = scalar_lea.hbm %s1291_s5, 1600 }
 0x1ff   : > { %p1014_p7 = scmp.ne.s32.totalorder %s1239_s30, %s1013_s10  ;;  %p1018_p10 = scmp.lt.u32.totalorder %s1239_s30, %s1291_s5 }
 0x200   : > { %p1019_p11 = scmp.lt.u32.totalorder %s1017_s13, %s1013_s10  ;;  %p1021_p0 = scmp.lt.u32.totalorder %s1013_s10, %s1239_s30 }
 0x201   : > { %p1015_p8 = pnand %p1014_p7, %p817_p12 }
 0x202   : > { %p1020_p13 = por %p1019_p11, %p1018_p10 }
 0x203   : > { %p1016_p9 = pneg %p1015_p8 }
 0x204   : > { %p1022_p1 = por %p1021_p0, %p1020_p13 }
 0x206   : > { %p1023_p2 = pnand %p1022_p1, %p1016_p9 }
 0x208   : > { %1026 = shalt.err (!%p1023_p2)
}
 0x209   : > { %s1064_s23 = smov 64   ;;  %s1065_s25 = smov 4  }
 0x20a   : > { %711 = dma.vmem_to_hbm [thread:$0]  (%p817_p12), %s1242_s7, %s1230_s17, %s1239_s30, %s1225_s15, %s1064_s23, %s1064_s23, %s1065_s25  }
 0x20b PF: > { %p958_p3 = scmp.ge.s32.totalorder %s1061_s21, 2  ;;  %s720_s26 = sand.u32 1, %s1049_s18  }
 0x20c   : > { %s721_s28 = scalar_lea.sflag [#allocation3], %s720_s26 }
 0x20d   : > { %p955_p4 = pnand %p958_p3, %p1138_p6 }
 0x20f   : > { %1044 = dma.done.wait (!%p955_p4), %s721_s28, 1024  }
 0x210   : > { %1046 = vsyncadd (!%p955_p4), %s721_s28, 4294966272  ;;  %p15_p5 = scmp.ge.s32.totalorder %s1121_s24, 4   ;;  %s1294_s18 = smov %s1053_s19 }
 0x211   : > { %s1295_s19 = smov %s1057_s20  ;;  %s1296_s20 = smov %s1132_s27 }
 0x212   : > { %s1297_s21 = smov %s1121_s24  ;;  %17 = sbr.rel (!%p15_p5) target bundleno = 3 (0x3), region = 75 }
 0x219   :  { %726 = vsyncpa [#allocation3], 1 }
 0x21a   :  { %728 = vsyncpa [#allocation3 + $0x1], 1 }

// kernel: tpu_custom_call.1
= control target key start
LH: loop header
LB: loop body
LE: loop exit
PB: predicated region body
PF: predicated region fallthrough
CT: control target
= control target key end

     0   :  { %10 = vsyncpa [#allocation3], 0  ;;  %s1286_s0 = inlined_call_operand.vmem [shape: f32[200,32], index: 0, kind: input, shape index: {}]   ;;  %s1287_s1 = inlined_call_operand.vmem [shape: bf16[32,64], index: 1, kind: input, shape index: {}]   ;;  %s1288_s2 = inlined_call_operand.vmem [shape: f32[1,64], index: 2, kind: input, shape index: {}]   ;;  %s1289_s3 = inlined_call_operand.vmem [shape: bf16[64,128], index: 3, kind: input, shape index: {}]   ;;  %s1290_s4 = inlined_call_operand.vmem [shape: f32[1,128], index: 4, kind: input, shape index: {}]   ;;  %s1291_s5 = inlined_call_operand.hbm [shape: bf16[200,128], index: 5, kind: output, shape index: {}]  }
   0x1   :  { %12 = vsyncpa [#allocation3 + $0x1], 0  ;;  %s1096_s18 = smov 0   ;;  %s1098_s19 = smov 0  }
   0x2   :  { %s1100_s20 = smov 0   ;;  %s1102_s21 = smov 0  }
   0x3 LB: > { %s1117_s22 = sadd.s32 4294967295, %s1061_s21   ;;  %s767_s23 = sadd.s32 4294967294, %s1061_s21   ;;  %s1061_s21 = sphi %s1102_s21, %s1297_s21   ;;  %s1057_s20 = sphi %s1100_s20, %s1296_s20   ;;  %s1053_s19 = sphi %s1098_s19, %s1295_s19   ;;  %s1049_s18 = sphi %s1096_s18, %s1294_s18  }
   0x4   : > { %s1121_s24 = sadd.s32 1, %s1061_s21   ;;  %s135_s25 = sadd.s32 1, %s1057_s20 }
   0x5   : > { %s132_s26 = ssub.s32 %s1061_s21, %s1121_s24  ;;  %p145_p0 = scmp.ne.s32.totalorder %s1057_s20, %s1053_s19 }
   0x6   : > { %p133_p1 = scmp.eq.s32.totalorder %s132_s26, 0  ;;  %p146_p2 = scmp.eq.s32.totalorder %s1117_s22, 1 }
   0x7   : > { %p151_p3 = scmp.ne.s32.totalorder %s1053_s19, %s1049_s18  ;;  %p152_p4 = scmp.eq.s32.totalorder %s767_s23, 1 }
   0x8   : > { %s1132_s27 = scalar_select %p133_p1, %s1057_s20, %s135_s25  }
   0x9   : > { %p1134_p5 = por %p146_p2, %p145_p0  ;;  %p1138_p6 = por %p152_p4, %p151_p3 }
   0xa   : > { %p770_p7 = scmp.ge.s32.totalorder %s1061_s21, 1  ;;  %p199_p8 = scmp.lt.s32.totalorder %s1061_s21, 3 }
   0xc   : > { %p200_p9 = pnand %p770_p7, %p199_p8 }
   0xd   : > { %v993_v0 = vld [vmem:[%s1287_s1] sm:$0xff] (!%p200_p9)   ;;  %s1148_s7 = sshll.u32 (!%p200_p9), %s1117_s22, 4  ;;  %v994_v1 = vld [vmem:[%s1287_s1 + $0x8] sm:$0xff] (!%p200_p9)   ;;  %vm298_vm0 = vcmask (!%p200_p9), 261120   ;;  %v997_v28 = vld [vmem:[%s1289_s3 + $0x10] sm:$0xff] (!%p200_p9)   ;;  %vm483_vm1 = vcmask (!%p200_p9), 523264  }
   0xe   : > { %203 = sbr.rel (%p200_p9) target bundleno = 523 (0x20b), region = 40  ;;  %p236_p10 = scmp.lt.s32.totalorder (!%p200_p9), %s1148_s7, 24  ;;  %909 = vmatprep.subr.bf16.mxu0 (!%p200_p9), %v993_v0  ;;  %v995_v2 = vld [vmem:[%s1289_s3] sm:$0xff] (!%p200_p9)   ;;  %v996_v3 = vld [vmem:[%s1289_s3 + $0x8] sm:$0xff] (!%p200_p9)   ;;  %v998_v29 = vld [vmem:[%s1289_s3 + $0x18] sm:$0xff] (!%p200_p9)  }
   0xf   : > { %910 = vmatpush3.bf16.msra.mxu0 (!%p200_p9), %v993_v0  ;;  %929 = vmatprep.subr.bf16.mxu1 (!%p200_p9), %v995_v2  ;;  %v774_v30 = vld [vmem:[%s1288_s2] ss:$0 sm:$0xff] (!%p200_p9)  ;;  %s228_s10 = sand.u32 (!%p200_p9), 1, %s1053_s19  }
  0x10   : > { %911 = vmatprep.subr.bf16.mxu0 (!%p200_p9), %v994_v1  ;;  %930 = vmatpush3.bf16.msra.mxu1 (!%p200_p9), %v995_v2  ;;  %s771_s13 = sshll.u32 (!%p200_p9), %s228_s10, 6 }
  0x11   : > { %931 = vmatprep.subr.bf16.mxu1 (!%p200_p9), %v996_v3  ;;  %s1213_s14 = scalar_lea.vmem (!%p200_p9), [#allocation2], %s771_s13 }
  0x13   : > { %912 = vmatpush3.bf16.msra.mxu0 (!%p200_p9), %v994_v1 }
  0x14   : > { %932 = vmatpush3.bf16.msra.mxu1 (!%p200_p9), %v996_v3 }
  0x15   : > { %s237_s12 = scalar_select %p236_p10, %s1148_s7, 24  ;;  %933 = vmatprep.subr.bf16.mxu1 %v997_v28 }
  0x16   : > { %s694_s16 = ssub.s32 (%p1134_p5), 25, %s1148_s7 }
  0x17   : > { %s773_s15 = sshll.u32 %s237_s12, 3  ;;  %p695_p11 = scmp.lt.s32.totalorder (%p1134_p5), %s694_s16, 16 }
  0x18   : > { %s1164_s23 = scalar_lea.vmem %s1286_s0, %s773_s15  ;;  %934 = vmatpush3.bf16.msra.mxu1 %v997_v28  ;;  %s1225_s15 = scalar_lea.sflag [#allocation3], %s228_s10 }
  0x19   : > { %v251_v4 = vld [vmem:[%s1164_s23] sm:$0xff]  ;;  %v252_v5 = vld [vmem:[%s1164_s23 + $0x8] sm:$0xff]  ;;  %v253_v6 = vld [vmem:[%s1164_s23 + $0x10] sm:$0xff]  ;;  %935 = vmatprep.subr.bf16.mxu1 %v998_v29 }
  0x1a   : > { %v267_v7 = vpack.c.bf16 %v252_v5, %v251_v4  ;;  %v254_v8 = vld [vmem:[%s1164_s23 + $0x18] sm:$0xff]  ;;  %v255_v9 = vld [vmem:[%s1164_s23 + $0x20] sm:$0xff]  ;;  %v256_v10 = vld [vmem:[%s1164_s23 + $0x28] sm:$0xff] }
  0x1b   : > { %v268_v11 = vpack.c.bf16 %v254_v8, %v253_v6  ;;  %v269_v12 = vpack.c.bf16 %v256_v10, %v255_v9  ;;  %v257_v13 = vld [vmem:[%s1164_s23 + $0x30] sm:$0xff]  ;;  %v258_v14 = vld [vmem:[%s1164_s23 + $0x38] sm:$0xff]  ;;  %v259_v15 = vld [vmem:[%s1164_s23 + $0x40] sm:$0xff] }
  0x1c   : > { %913 = vmatprep.mubr.msk.bf16.mxu0 %vm298_vm0, %v267_v7  ;;  %v260_v16 = vld [vmem:[%s1164_s23 + $0x48] sm:$0xff]  ;;  %v270_v17 = vpack.c.bf16 %v258_v14, %v257_v13  ;;  %v261_v19 = vld [vmem:[%s1164_s23 + $0x50] sm:$0xff]  ;;  %v262_v20 = vld [vmem:[%s1164_s23 + $0x58] sm:$0xff]  ;;  %936 = vmatpush3.bf16.msra.mxu1 %v998_v29 }
  0x1d   : > { %914 = vmatmul.mubr.msk.bf16.vlgmr.msra.gmra.mrb[0].mxu0 %vm298_vm0, %v268_v11  ;;  %v271_v18 = vpack.c.bf16 %v260_v16, %v259_v15  ;;  %v263_v21 = vld [vmem:[%s1164_s23 + $0x60] sm:$0xff]  ;;  %v264_v22 = vld [vmem:[%s1164_s23 + $0x68] sm:$0xff]  ;;  %v272_v23 = vpack.c.bf16 %v262_v20, %v261_v19  ;;  %v265_v25 = vld [vmem:[%s1164_s23 + $0x70] sm:$0xff] }
  0x1e   : > { %917 = vmatprep.mubr.msk.bf16.mxu0 %vm298_vm0, %v269_v12  ;;  %v273_v24 = vpack.c.bf16 %v264_v22, %v263_v21  ;;  %v266_v26 = vld [vmem:[%s1164_s23 + $0x78] sm:$0xff] }
  0x1f   : > { %v274_v27 = vpack.c.bf16 %v266_v26, %v265_v25 }
  0x25   : > { %918 = vmatmul.mubr.msk.bf16.gmra.mrb[4].mxu0 %vm298_vm0, %v270_v17 }
  0x26   : > { %921 = vmatprep.mubr.msk.bf16.mxu0 %vm298_vm0, %v271_v18 }
  0x2d   : > { %922 = vmatmul.mubr.msk.bf16.gmra.mrb[8].mxu0 %vm298_vm0, %v272_v23 }
  0x2e   : > { %925 = vmatprep.mubr.msk.bf16.mxu0 %vm298_vm0, %v273_v24  ;;  %v785_v24 = vld [vmem:[%s1290_s4] ss:$0 sm:$0xff] }
  0x35   : > { %926 = vmatmul.mubr.msk.bf16.gmra.mrb[12].mxu0 %vm298_vm0, %v274_v27 }
  0xf0   : > { %v915_v31 = vpop.f32.mrb[0].mxu0 }
  0xf1   : > { %v366_v32 = vadd.f32 %v915_v31, %v774_v30  ;;  %v357_v33 = vpop.f32.mrb[1].mxu0 }
  0xf2   : > { %v358_v34 = vadd.f32 %v774_v30, %v357_v33  ;;  %v916_v35 = vpop.f32.mrb[2].mxu0 }
  0xf3   : > { %v369_v36 = vadd.f32 %v916_v35, %v774_v30  ;;  %v360_v37 = vpop.f32.mrb[3].mxu0  ;;  %v422_v39 = vmax.f32 %v366_v32, 0.0 }
  0xf4   : > { %v361_v38 = vadd.f32 %v774_v30, %v360_v37  ;;  %v420_v41 = vmax.f32 %v358_v34, 0.0 }
  0xf5   : > { %v423_v40 = vmax.f32 %v369_v36, 0.0 }
  0xf6   : > { %v421_v42 = vmax.f32 %v361_v38, 0.0 }
  0xf7   : > { %v437_v43 = vpack.c.bf16 %v423_v40, %v422_v39 }
  0xf8   : > { %v919_v44 = vpop.f32.mrb[4].mxu0  ;;  %v436_v45 = vpack.c.bf16 %v421_v42, %v420_v41 }
  0xf9   : > { %v382_v46 = vadd.f32 %v919_v44, %v774_v30  ;;  %v373_v47 = vpop.f32.mrb[5].mxu0 }
  0xfa   : > { %v374_v48 = vadd.f32 %v774_v30, %v373_v47  ;;  %v920_v49 = vpop.f32.mrb[6].mxu0  ;;  %937 = vmatprep.mubr.msk.bf16.mxu1 %vm483_vm1, %v436_v45 }
  0xfb   : > { %v385_v50 = vadd.f32 %v920_v49, %v774_v30  ;;  %v376_v51 = vpop.f32.mrb[7].mxu0  ;;  %938 = vmatmul.mubr.msk.bf16.vlgmr.msra.gmra.mrb[0].mxu1 %vm483_vm1, %v437_v43  ;;  %v426_v53 = vmax.f32 %v382_v46, 0.0 }
  0xfc   : > { %v377_v52 = vadd.f32 %v774_v30, %v376_v51  ;;  %v424_v55 = vmax.f32 %v374_v48, 0.0 }
  0xfd   : > { %v427_v54 = vmax.f32 %v385_v50, 0.0 }
  0xfe   : > { %v425_v56 = vmax.f32 %v377_v52, 0.0 }
  0xff   : > { %v439_v57 = vpack.c.bf16 %v427_v54, %v426_v53 }
 0x100   : > { %v438_v58 = vpack.c.bf16 %v425_v56, %v424_v55  ;;  %v923_v59 = vpop.f32.mrb[8].mxu0 }
 0x101   : > { %v398_v60 = vadd.f32 %v923_v59, %v774_v30  ;;  %v389_v61 = vpop.f32.mrb[9].mxu0 }
 0x102   : > { %v390_v62 = vadd.f32 %v774_v30, %v389_v61  ;;  %v924_v63 = vpop.f32.mrb[10].mxu0  ;;  %941 = vmatprep.mubr.msk.bf16.mxu1 %vm483_vm1, %v438_v58 }
 0x103   : > { %v401_v0 = vadd.f32 %v924_v63, %v774_v30  ;;  %v392_v1 = vpop.f32.mrb[11].mxu0  ;;  %942 = vmatmul.mubr.msk.bf16.gmra.mrb[4].mxu1 %vm483_vm1, %v439_v57  ;;  %v430_v3 = vmax.f32 %v398_v60, 0.0 }
 0x104   : > { %v393_v2 = vadd.f32 %v774_v30, %v392_v1  ;;  %v428_v5 = vmax.f32 %v390_v62, 0.0 }
 0x105   : > { %v431_v4 = vmax.f32 %v401_v0, 0.0 }
 0x106   : > { %v429_v6 = vmax.f32 %v393_v2, 0.0 }
 0x107   : > { %v441_v7 = vpack.c.bf16 %v431_v4, %v430_v3 }
 0x108   : > { %v440_v8 = vpack.c.bf16 %v429_v6, %v428_v5  ;;  %v927_v9 = vpop.f32.mrb[12].mxu0 }
 0x109   : > { %v414_v10 = vadd.f32 %v927_v9, %v774_v30  ;;  %v405_v11 = vpop.f32.mrb[13].mxu0 }
 0x10a   : > { %v406_v12 = vadd.f32 %v774_v30, %v405_v11  ;;  %v928_v13 = vpop.f32.mrb[14].mxu0  ;;  %945 = vmatprep.mubr.msk.bf16.mxu1 %vm483_vm1, %v440_v8 }
 0x10b   : > { %v417_v14 = vadd.f32 %v928_v13, %v774_v30  ;;  %v408_v15 = vpop.f32.mrb[15].mxu0  ;;  %946 = vmatmul.mubr.msk.bf16.gmra.mrb[8].mxu1 %vm483_vm1, %v441_v7  ;;  %v434_v17 = vmax.f32 %v414_v10, 0.0 }
 0x10c   : > { %v409_v16 = vadd.f32 %v774_v30, %v408_v15  ;;  %v432_v19 = vmax.f32 %v406_v12, 0.0 }
 0x10d   : > { %v435_v18 = vmax.f32 %v417_v14, 0.0 }
 0x10e   : > { %v433_v20 = vmax.f32 %v409_v16, 0.0 }
 0x10f   : > { %v443_v21 = vpack.c.bf16 %v435_v18, %v434_v17 }
 0x110   : > { %v442_v22 = vpack.c.bf16 %v433_v20, %v432_v19 }
 0x112   : > { %949 = vmatprep.mubr.msk.bf16.mxu1 %vm483_vm1, %v442_v22 }
 0x113   : > { %950 = vmatmul.mubr.msk.bf16.gmra.mrb[12].mxu1 %vm483_vm1, %v443_v21 }
 0x1ce   : > { %v939_v23 = vpop.f32.mrb[0].mxu1 }
 0x1cf   : > { %v542_v25 = vpop.f32.mrb[1].mxu1  ;;  %v551_v27 = vadd.f32 %v939_v23, %v785_v24 }
 0x1d0   : > { %v940_v26 = vpop.f32.mrb[2].mxu1  ;;  %v543_v30 = vadd.f32 %v785_v24, %v542_v25 }
 0x1d1   : > { %v554_v28 = vadd.f32 %v940_v26, %v785_v24  ;;  %v545_v29 = vpop.f32.mrb[3].mxu1 }
 0x1d2   : > { %v546_v31 = vadd.f32 %v785_v24, %v545_v29 }
 0x1d3   : > { %v848_v32 = vpack.c.bf16 %v554_v28, %v551_v27 }
 0x1d4   : > { %v843_v33 = vpack.c.bf16 %v546_v31, %v543_v30 }
 0x1d5   : > { %880 = vst [vmem:[%s1213_s14 + $0x8] sm:$0xff] %v848_v32  }
 0x1d6   : > { %844 = vst [vmem:[%s1213_s14] sm:$0xff] %v843_v33   ;;  %v943_v34 = vpop.f32.mrb[4].mxu1 }
 0x1d7   : > { %v558_v35 = vpop.f32.mrb[5].mxu1  ;;  %v567_v37 = vadd.f32 %v943_v34, %v785_v24 }
 0x1d8   : > { %v944_v36 = vpop.f32.mrb[6].mxu1  ;;  %v559_v40 = vadd.f32 %v785_v24, %v558_v35 }
 0x1d9   : > { %v570_v38 = vadd.f32 %v944_v36, %v785_v24  ;;  %v561_v39 = vpop.f32.mrb[7].mxu1 }
 0x1da   : > { %v562_v41 = vadd.f32 %v785_v24, %v561_v39 }
 0x1db   : > { %v858_v42 = vpack.c.bf16 %v570_v38, %v567_v37 }
 0x1dc   : > { %v853_v43 = vpack.c.bf16 %v562_v41, %v559_v40 }
 0x1dd   : > { %882 = vst [vmem:[%s1213_s14 + $0x18] sm:$0xff] %v858_v42  }
 0x1de   : > { %881 = vst [vmem:[%s1213_s14 + $0x10] sm:$0xff] %v853_v43   ;;  %v947_v44 = vpop.f32.mrb[8].mxu1 }
 0x1df   : > { %v574_v45 = vpop.f32.mrb[9].mxu1  ;;  %v583_v47 = vadd.f32 %v947_v44, %v785_v24 }
 0x1e0   : > { %v948_v46 = vpop.f32.mrb[10].mxu1  ;;  %v575_v50 = vadd.f32 %v785_v24, %v574_v45 }
 0x1e1   : > { %v586_v48 = vadd.f32 %v948_v46, %v785_v24  ;;  %v577_v49 = vpop.f32.mrb[11].mxu1 }
 0x1e2   : > { %v578_v51 = vadd.f32 %v785_v24, %v577_v49 }
 0x1e3   : > { %v868_v52 = vpack.c.bf16 %v586_v48, %v583_v47 }
 0x1e4   : > { %v863_v53 = vpack.c.bf16 %v578_v51, %v575_v50 }
 0x1e5   : > { %884 = vst [vmem:[%s1213_s14 + $0x28] sm:$0xff] %v868_v52  }
 0x1e6   : > { %883 = vst [vmem:[%s1213_s14 + $0x20] sm:$0xff] %v863_v53   ;;  %v951_v54 = vpop.f32.mrb[12].mxu1 }
 0x1e7   : > { %v590_v55 = vpop.f32.mrb[13].mxu1  ;;  %v599_v57 = vadd.f32 %v951_v54, %v785_v24 }
 0x1e8   : > { %v952_v56 = vpop.f32.mrb[14].mxu1  ;;  %v591_v60 = vadd.f32 %v785_v24, %v590_v55  ;;  %692 = sbr.rel (!%p1134_p5) target bundleno = 523 (0x20b), region = 44 }
 0x1e9   : > { %v602_v58 = vadd.f32 %v952_v56, %v785_v24  ;;  %v593_v59 = vpop.f32.mrb[15].mxu1 }
 0x1ea   : > { %v594_v61 = vadd.f32 %v785_v24, %v593_v59 }
 0x1eb   : > { %v878_v62 = vpack.c.bf16 %v602_v58, %v599_v57 }
 0x1ec   : > { %v873_v63 = vpack.c.bf16 %v594_v61, %v591_v60 }
 0x1ed   : > { %886 = vst [vmem:[%s1213_s14 + $0x38] sm:$0xff] %v878_v62  }
 0x1ee   : > { %885 = vst [vmem:[%s1213_s14 + $0x30] sm:$0xff] %v873_v63  }
 0x1ef   : > { %s1299_s16 = smov (!%p695_p11, %s694_s16), 16 }
 0x1f0   : > { %s1230_s17 = sshll.u32 %s1299_s16, 6 }
 0x1f1   : > { %s699_s23 = ssub.s32 1024, %s1230_s17 }
 0x1f2   : > { %700 = vsyncadd %s1225_s15, %s699_s23  ;;  %p817_p12 = scmp.ne.s32.totalorder %s1230_s17, 0  ;;  %s839_s25 = sshll.u32 %s1117_s22, 10 }
 0x1f3   : > { %s1239_s30 = scalar_lea.hbm %s1291_s5, %s839_s25  ;;  %s705_s7 = sshll.u32 %s1213_s14, 4  ;;  %s1242_s7 = int_to_ptr.vmem [resolvable:$true] %s705_s7 }
 0x1f4   : > { %s999_s6 = scalar_lea.vmem %s1242_s7, %s1230_s17  ;;  %s1063_s8 = smov [#allocation2]  }
 0x1f5   : > { %p1000_p13 = scmp.ne.s32.totalorder %s1242_s7, %s999_s6  ;;  %s1003_s9 = sshll.u32 %s1063_s8, 4  ;;  %s1004_s9 = int_to_ptr.vmem [resolvable:$false] %s1003_s9 }
 0x1f6   : > { %s1005_s22 = scalar_lea.vmem %s1004_s9, 2048  ;;  %p1006_p2 = scmp.lt.s32.totalorder %s1242_s7, %s1004_s9 }
 0x1f7   : > { %p1001_p0 = pnand %p1000_p13, %p817_p12  ;;  %p1007_p3 = scmp.lt.s32.totalorder %s1005_s22, %s999_s6 }
 0x1f9   : > { %p1002_p1 = pneg %p1001_p0  ;;  %p1008_p4 = por %p1007_p3, %p1006_p2 }
 0x1fb   : > { %p1009_p5 = pnand %p1008_p4, %p1002_p1 }
 0x1fd   : > { %1012 = shalt.err (!%p1009_p5)
}
 0x1fe   : > { %s1013_s10 = scalar_lea.hbm %s1239_s30, %s1230_s17  ;;  %s1017_s13 = scalar_lea.hbm %s1291_s5, 1600 }
 0x1ff   : > { %p1014_p7 = scmp.ne.s32.totalorder %s1239_s30, %s1013_s10  ;;  %p1018_p10 = scmp.lt.u32.totalorder %s1239_s30, %s1291_s5 }
 0x200   : > { %p1019_p11 = scmp.lt.u32.totalorder %s1017_s13, %s1013_s10  ;;  %p1021_p0 = scmp.lt.u32.totalorder %s1013_s10, %s1239_s30 }
 0x201   : > { %p1015_p8 = pnand %p1014_p7, %p817_p12 }
 0x202   : > { %p1020_p13 = por %p1019_p11, %p1018_p10 }
 0x203   : > { %p1016_p9 = pneg %p1015_p8 }
 0x204   : > { %p1022_p1 = por %p1021_p0, %p1020_p13 }
 0x206   : > { %p1023_p2 = pnand %p1022_p1, %p1016_p9 }
 0x208   : > { %1026 = shalt.err (!%p1023_p2)
}
 0x209   : > { %s1064_s23 = smov 64   ;;  %s1065_s25 = smov 4  }
 0x20a   : > { %711 = dma.vmem_to_hbm [thread:$0]  (%p817_p12), %s1242_s7, %s1230_s17, %s1239_s30, %s1225_s15, %s1064_s23, %s1064_s23, %s1065_s25  }
 0x20b PF: > { %p958_p3 = scmp.ge.s32.totalorder %s1061_s21, 2  ;;  %s720_s26 = sand.u32 1, %s1049_s18  }
 0x20c   : > { %s721_s28 = scalar_lea.sflag [#allocation3], %s720_s26 }
 0x20d   : > { %p955_p4 = pnand %p958_p3, %p1138_p6 }
 0x20f   : > { %1044 = dma.done.wait (!%p955_p4), %s721_s28, 1024  }
 0x210   : > { %1046 = vsyncadd (!%p955_p4), %s721_s28, 4294966272  ;;  %p15_p5 = scmp.ge.s32.totalorder %s1121_s24, 4   ;;  %s1294_s18 = smov %s1053_s19 }
 0x211   : > { %s1295_s19 = smov %s1057_s20  ;;  %s1296_s20 = smov %s1132_s27 }
 0x212   : > { %s1297_s21 = smov %s1121_s24  ;;  %17 = sbr.rel (!%p15_p5) target bundleno = 3 (0x3), region = 75 }
 0x219   :  { %726 = vsyncpa [#allocation3], 1 }
 0x21a   :  { %728 = vsyncpa [#allocation3 + $0x1], 1 }

</bundles_post_ra>
